<compile_context>
chip_gen: v7x
topology: tpu7x:2x2x1
jax: 0.10.0
libtpu: 0.0.40
codegen_flags: <defaults>
</compile_context>

<pallas_src>
import functools

import numpy as np
import jax
import jax.numpy as jnp
from jax import lax
from jax.experimental import pallas as pl
from jax.experimental.pallas import tpu as pltpu


def _round_up(x, m):
    return ((x + m - 1) // m) * m


def _mask_path_kernel(ptr0_ref, deg0_ref, samp_ref, rand_ref, tab_ref,   # inputs
                      eid_ref,                                           # output
                      ptr_sc, deg_sc, eidm_sc, nxt_sc,                   # scratch
                      *, p, edge_tile, e_pad):
    """Grid = (walk_length, num_edge_blocks).  Emits the chosen edge id per walk per step."""
    t = pl.program_id(0)          # walk step
    b = pl.program_id(1)          # edge-id block
    nb = pl.num_programs(1)
    f32 = jnp.float32
    bf16 = jnp.bfloat16

    @pl.when((t == 0) & (b == 0))
    def _init():
        ptr_sc[...] = ptr0_ref[...]        # rowptr[start node of each walk]
        deg_sc[...] = deg0_ref[...]        # out-degree of start node

    @pl.when(b == 0)
    def _begin_step():
        ptr = ptr_sc[...]                                         # (1, E_pad) int32
        deg = deg_sc[...]
        u = rand_ref[0]                                           # (1, E_pad) f32, lane-dense
        r = jnp.floor(u * deg.astype(f32)).astype(jnp.int32)
        r = jnp.minimum(r, jnp.maximum(deg - 1, 0))
        step = (samp_ref[...] <= p) & (deg > 0)                   # walk takes an edge now
        eidm = jnp.where(step, ptr + r, -1)                       # -1 == no edge taken
        eidm_sc[...] = eidm
        eid_ref[...] = eidm.reshape(1, 1, e_pad)                  # lane-dense per-step output
        nxt_sc[...] = jnp.zeros_like(nxt_sc)

    # ---- per edge-id block (tiled, grid axis 1) ----
    base = pl.multiple_of(b * edge_tile, edge_tile)
    eidm_local = eidm_sc[...] - base                              # (1, E_pad) cheap shift
    any_hit = jnp.any((eidm_local >= 0) & (eidm_local < edge_tile))

    @pl.when(any_hit)                                             # skip untouched blocks
    def _gather_block():
        # Block/step-invariant iota; the per-block 'base' is folded into eidm_local above.
        j_iota = lax.broadcasted_iota(jnp.int32, (edge_tile, e_pad), 0)
        oh_bf = (eidm_local == j_iota).astype(bf16)               # (edge_tile, E_pad) bf16
        # One M=8 bf16 MXU push gathers ptr_next_hi/lo and deg_next_hi/lo for every walk.
        nxt_sc[...] += jnp.dot(tab_ref[...].astype(bf16), oh_bf,
                               preferred_element_type=f32)

    @pl.when(b == nb - 1)
    def _end_step():
        stepped = eidm_sc[...] >= 0
        nxt = nxt_sc[...]                                         # f32, exact for ids < 2^24
        ptr_next = (nxt[0:1, :] * 256.0 + nxt[1:2, :] + 0.5).astype(jnp.int32)
        deg_next = (nxt[2:3, :] * 256.0 + nxt[3:4, :] + 0.5).astype(jnp.int32)
        ptr_sc[...] = jnp.where(stepped, ptr_next, ptr_sc[...])   # deg==0 walks stay put
        deg_sc[...] = jnp.where(stepped, deg_next, deg_sc[...])


def mask_path_pallas(edge_index, p, num_nodes, samp, rand, *, edge_tile=None,
                     interpret=False):
    """Returns (sorted_edge_index (2,E) int32, remaining_mask (E,) bool).

    samp: (E,) f32 uniforms for start sampling (one walk per sorted edge, walks_per_node=1).
    rand: (walk_length, E) f32 uniforms for neighbor choice.
    """
    row = edge_index[0].astype(jnp.int32)
    col = edge_index[1].astype(jnp.int32)
    E = int(row.shape[0])
    N = int(num_nodes)
    L = int(rand.shape[0])
    f32 = jnp.float32

    # sort_edge_index: lexicographic by (row, col); no int32 key overflow.
    perm = jnp.lexsort((col, row))
    row_s = row[perm]
    col_s = col[perm]

    # CSR rowptr and all node->edge lookups hoisted out of the kernel.
    rowptr = jnp.searchsorted(row_s, jnp.arange(N + 1, dtype=jnp.int32),
                              side='left').astype(jnp.int32)
    deg_all = rowptr[1:] - rowptr[:-1]            # out-degree per node
    ptr0 = rowptr[row_s]                          # walk-state seed: rowptr[start node]
    deg0 = deg_all[row_s]
    ptr_nx = rowptr[col_s]                        # per-edge destination tables
    deg_nx = deg_all[col_s]

    # Per-generation tiling / VMEM budget.
    kind = ""
    try:
        kind = jax.devices()[0].device_kind.lower()
    except Exception:
        pass
    if edge_tile is None:
        max_tile = 512 if "v7" in kind else 1024
        edge_tile = min(max_tile, max(128, _round_up(E, 128)))
    if "v7" in kind:
        vmem_limit = 48 * 1024 * 1024
    elif ("v6" in kind) or ("v5" in kind):
        vmem_limit = 100 * 1024 * 1024
    else:
        vmem_limit = None
    e_pad = _round_up(max(E, 1), edge_tile)
    n_blocks = e_pad // edge_tile

    # Lane-dense, padded kernel inputs (padded lanes never step: samp = 2.0 > p).
    ptr0_in = jnp.zeros((1, e_pad), jnp.int32).at[0, :E].set(ptr0)
    deg0_in = jnp.zeros((1, e_pad), jnp.int32).at[0, :E].set(deg0)
    samp_in = jnp.full((1, e_pad), 2.0, f32).at[0, :E].set(samp.astype(f32))
    rand_in = jnp.full((L, 1, e_pad), 0.5, f32).at[:, 0, :E].set(rand.astype(f32))

    # Base-256 digit-split gather table: every row value <= 256 is exact in bf16, so the
    # in-kernel matmuls stay single-pass bf16 at default precision.
    # TODO(synk): two digits are exact only for rowptr values up to ~65.5K; graphs with more
    # edges need a third digit row.
    tab = jnp.zeros((8, e_pad), f32)
    tab = tab.at[0, :E].set((ptr_nx // 256).astype(f32))
    tab = tab.at[1, :E].set((ptr_nx % 256).astype(f32))
    tab = tab.at[2, :E].set((deg_nx // 256).astype(f32))
    tab = tab.at[3, :E].set((deg_nx % 256).astype(f32))

    kernel = functools.partial(_mask_path_kernel, p=float(p),
                               edge_tile=edge_tile, e_pad=e_pad)

    eids = pl.pallas_call(
        kernel,
        out_shape=jax.ShapeDtypeStruct((L, 1, e_pad), jnp.int32),
        grid=(L, n_blocks),
        in_specs=[
            pl.BlockSpec((1, e_pad), lambda t, b: (0, 0)),         # rowptr[start node]
            pl.BlockSpec((1, e_pad), lambda t, b: (0, 0)),         # deg[start node]
            pl.BlockSpec((1, e_pad), lambda t, b: (0, 0)),         # start-sampling uniforms
            pl.BlockSpec((1, 1, e_pad), lambda t, b: (t, 0, 0)),   # per-step uniforms
            pl.BlockSpec((8, edge_tile), lambda t, b: (0, b)),     # digit-split dest tables
        ],
        out_specs=pl.BlockSpec((1, 1, e_pad), lambda t, b: (t, 0, 0)),  # chosen edge ids
        scratch_shapes=[
            pltpu.VMEM((1, e_pad), jnp.int32),     # ptr (rowptr[cur]) per walk
            pltpu.VMEM((1, e_pad), jnp.int32),     # deg (out-degree of cur) per walk
            pltpu.VMEM((1, e_pad), jnp.int32),     # edge id taken this step (-1 = none)
            pltpu.VMEM((8, e_pad), jnp.float32),   # partial gather accumulator
        ],
        compiler_params=pltpu.CompilerParams(
            dimension_semantics=("arbitrary", "arbitrary"),
            vmem_limit_bytes=vmem_limit),
        interpret=interpret,
    )(ptr0_in, deg0_in, samp_in, rand_in, tab)

    # edge_mask[e_id] = False, done with one XLA scatter-add (same split as torch: the custom
    # op returns e_id, the masking happens outside it).
    eid_flat = eids[:, 0, :E].reshape(-1)
    safe_idx = jnp.where(eid_flat >= 0, eid_flat, E)          # route "no edge" to a dump slot
    hits = jnp.zeros((E + 1,), jnp.int32).at[safe_idx].add(1)
    remaining_mask = hits[:E] == 0
    sorted_edge_index = jnp.stack([row_s, col_s], axis=0)
    return sorted_edge_index, remaining_mask


def host_postprocess(sorted_edge_index, remaining_mask, num_nodes):
    # TODO(synk): dynamic-shape boolean selection + to_undirected coalesce have no
    # static-shape Pallas equivalent; done on host with numpy.
    ei = np.asarray(sorted_edge_index)
    m = np.asarray(remaining_mask).astype(bool)
    remaining = ei[:, m]
    masked = ei[:, ~m]
    und = np.concatenate([remaining, remaining[::-1]], axis=1)
    keys = und[0].astype(np.int64) * np.int64(num_nodes) + und[1].astype(np.int64)
    _, idx = np.unique(keys, return_index=True)
    return und[:, idx], masked


def _mask_path_reference(sorted_edge_index, p, samp, rand, num_nodes):
    """Numpy replay of the same walks (same uniforms) for an exact correctness check."""
    ei = np.asarray(sorted_edge_index)
    row_s, col_s = ei[0], ei[1]
    E = row_s.shape[0]
    L = rand.shape[0]
    rowptr = np.searchsorted(row_s, np.arange(num_nodes + 1), side='left')
    samp = np.asarray(samp, dtype=np.float32)
    rand = np.asarray(rand, dtype=np.float32)
    counts = np.zeros(E, dtype=np.int64)
    for w in range(E):
        if not (samp[w] <= np.float32(p)):
            continue
        cur = int(row_s[w])
        for t in range(L):
            ptr = int(rowptr[cur])
            deg = int(rowptr[cur + 1]) - ptr
            if deg == 0:
                continue                       # walk stays at cur, no edge marked
            r = int(np.floor(np.float32(rand[t, w]) * np.float32(deg)))
            r = min(r, deg - 1)
            eid = ptr + r
            counts[eid] += 1
            cur = int(col_s[eid])
    return counts == 0


if __name__ == "__main__":
    num_nodes = 12
    num_edges = 32
    p = 0.5
    walk_length = 3

    key = jax.random.PRNGKey(0)
    k_row, k_col, k_samp, k_rand = jax.random.split(key, 4)
    row = jax.random.randint(k_row, (num_edges,), 0, num_nodes, dtype=jnp.int32)
    col = jax.random.randint(k_col, (num_edges,), 0, num_nodes, dtype=jnp.int32)
    edge_index = jnp.stack([row, col], axis=0)                     # (2, E)

    samp = jax.random.uniform(k_samp, (num_edges,), dtype=jnp.float32)
    rand = jax.random.uniform(k_rand, (walk_length, num_edges), dtype=jnp.float32)

    sorted_ei, remaining_mask = mask_path_pallas(edge_index, p, num_nodes, samp, rand)
    jax.block_until_ready(remaining_mask)

    ref_mask = _mask_path_reference(sorted_ei, p, samp, rand, num_nodes)
    assert np.array_equal(np.asarray(remaining_mask), ref_mask), "kernel/reference mismatch"

    remaining_und, masked_edges = host_postprocess(sorted_ei, remaining_mask, num_nodes)
    assert remaining_und.shape[0] == 2 and masked_edges.shape[0] == 2
    assert masked_edges.shape[1] + int(ref_mask.sum()) == num_edges
    print("KERNEL_OK")
</pallas_src>

<mosaic_0001>
module attributes {stable_mosaic.version = 11 : i64} {
  func.func @_mask_path_kernel(%arg0: i32, %arg1: i32, %arg2: memref<1x128xi32, #tpu.memory_space<vmem>>, %arg3: memref<1x128xi32, #tpu.memory_space<vmem>>, %arg4: memref<1x128xf32, #tpu.memory_space<vmem>>, %arg5: memref<1x1x128xf32, #tpu.memory_space<vmem>>, %arg6: memref<8x128xf32, #tpu.memory_space<vmem>>, %arg7: memref<1x1x128xi32, #tpu.memory_space<vmem>>, %arg8: memref<1x128xi32, #tpu.memory_space<vmem>>, %arg9: memref<1x128xi32, #tpu.memory_space<vmem>>, %arg10: memref<1x128xi32, #tpu.memory_space<vmem>>, %arg11: memref<8x128xf32, #tpu.memory_space<vmem>>) attributes {dimension_semantics = [#tpu.dimension_semantics<arbitrary>, #tpu.dimension_semantics<arbitrary>], iteration_bounds = array<i64: 3, 1>, scalar_prefetch = 0 : i64, scratch_operands = 4 : i64, tpu.core_type = #tpu.core_type<tc>, window_params = [{pipeline_mode = #tpu.pipeline_mode<synchronous>, transform_indices = @transform_0, window_bounds = array<i64: 1, 128>}, {pipeline_mode = #tpu.pipeline_mode<synchronous>, transform_indices = @transform_1, window_bounds = array<i64: 1, 128>}, {pipeline_mode = #tpu.pipeline_mode<synchronous>, transform_indices = @transform_2, window_bounds = array<i64: 1, 128>}, {transform_indices = @transform_3, window_bounds = array<i64: 1, 1, 128>}, {transform_indices = @transform_4, window_bounds = array<i64: 8, 128>}, {transform_indices = @transform_5, window_bounds = array<i64: 1, 1, 128>}]} {
    %c0_i32 = arith.constant 0 : i32
    %0 = arith.cmpi eq, %arg0, %c0_i32 : i32
    %c0_i32_0 = arith.constant 0 : i32
    %1 = arith.cmpi eq, %arg1, %c0_i32_0 : i32
    %2 = arith.andi %0, %1 : i1
    %3 = arith.extui %2 : i1 to i32
    %c0_i32_1 = arith.constant 0 : i32
    %4 = arith.cmpi ne, %3, %c0_i32_1 : i32
    scf.if %4 {
      %c0_13 = arith.constant 0 : index
      %c0_14 = arith.constant 0 : index
      %31 = vector.load %arg2[%c0_13, %c0_14] : memref<1x128xi32, #tpu.memory_space<vmem>>, vector<1x128xi32>
      %c0_15 = arith.constant 0 : index
      %c0_16 = arith.constant 0 : index
      %32 = vector.load %arg8[%c0_15, %c0_16] : memref<1x128xi32, #tpu.memory_space<vmem>>, vector<1x128xi32>
      tpu.vector_store %arg8[%c0_15, %c0_16], %31 {strides = array<i32>} : memref<1x128xi32, #tpu.memory_space<vmem>>, vector<1x128xi32>,
      %c0_17 = arith.constant 0 : index
      %c0_18 = arith.constant 0 : index
      %33 = vector.load %arg3[%c0_17, %c0_18] : memref<1x128xi32, #tpu.memory_space<vmem>>, vector<1x128xi32>
      %c0_19 = arith.constant 0 : index
      %c0_20 = arith.constant 0 : index
      %34 = vector.load %arg9[%c0_19, %c0_20] : memref<1x128xi32, #tpu.memory_space<vmem>>, vector<1x128xi32>
      tpu.vector_store %arg9[%c0_19, %c0_20], %33 {strides = array<i32>} : memref<1x128xi32, #tpu.memory_space<vmem>>, vector<1x128xi32>,
    } else {
    }
    %c0_i32_2 = arith.constant 0 : i32
    %5 = arith.cmpi eq, %arg1, %c0_i32_2 : i32
    %6 = arith.extui %5 : i1 to i32
    %c0_i32_3 = arith.constant 0 : i32
    %7 = arith.cmpi ne, %6, %c0_i32_3 : i32
    scf.if %7 {
      %c0_13 = arith.constant 0 : index
      %c0_14 = arith.constant 0 : index
      %31 = vector.load %arg8[%c0_13, %c0_14] : memref<1x128xi32, #tpu.memory_space<vmem>>, vector<1x128xi32>
      %c0_15 = arith.constant 0 : index
      %c0_16 = arith.constant 0 : index
      %32 = vector.load %arg9[%c0_15, %c0_16] : memref<1x128xi32, #tpu.memory_space<vmem>>, vector<1x128xi32>
      %c0_17 = arith.constant 0 : index
      %c0_18 = arith.constant 0 : index
      %c0_19 = arith.constant 0 : index
      %33 = vector.load %arg5[%c0_17, %c0_18, %c0_19] : memref<1x1x128xf32, #tpu.memory_space<vmem>>, vector<1x1x128xf32>
      %34 = vector.shape_cast %33 : vector<1x1x128xf32> to vector<1x128xf32>
      %35 = arith.sitofp %32 : vector<1x128xi32> to vector<1x128xf32>
      %36 = arith.mulf %34, %35 : vector<1x128xf32>
      %37 = math.floor %36 : vector<1x128xf32>
      %38 = arith.fptosi %37 : vector<1x128xf32> to vector<1x128xi32>
      %c1_i32 = arith.constant 1 : i32
      %39 = vector.broadcast %c1_i32 : i32 to vector<1x128xi32>
      %40 = arith.subi %32, %39 : vector<1x128xi32>
      %c0_i32_20 = arith.constant 0 : i32
      %41 = vector.broadcast %c0_i32_20 : i32 to vector<1x128xi32>
      %42 = arith.maxsi %40, %41 : vector<1x128xi32>
      %43 = arith.minsi %38, %42 : vector<1x128xi32>
      %c0_21 = arith.constant 0 : index
      %c0_22 = arith.constant 0 : index
      %44 = vector.load %arg4[%c0_21, %c0_22] : memref<1x128xf32, #tpu.memory_space<vmem>>, vector<1x128xf32>
      %cst_23 = arith.constant 5.000000e-01 : f32
      %45 = vector.broadcast %cst_23 : f32 to vector<1x128xf32>
      %46 = arith.cmpf ole, %44, %45 : vector<1x128xf32>
      %c0_i32_24 = arith.constant 0 : i32
      %47 = vector.broadcast %c0_i32_24 : i32 to vector<1x128xi32>
      %48 = arith.cmpi sgt, %32, %47 : vector<1x128xi32>
      %49 = arith.andi %46, %48 : vector<1x128xi1>
      %50 = arith.addi %31, %43 : vector<1x128xi32>
      %c-1_i32 = arith.constant -1 : i32
      %51 = vector.broadcast %c-1_i32 : i32 to vector<1x128xi32>
      %52 = arith.select %49, %50, %51 : vector<1x128xi1>, vector<1x128xi32>
      %c0_25 = arith.constant 0 : index
      %c0_26 = arith.constant 0 : index
      %53 = vector.load %arg10[%c0_25, %c0_26] : memref<1x128xi32, #tpu.memory_space<vmem>>, vector<1x128xi32>
      tpu.vector_store %arg10[%c0_25, %c0_26], %52 {strides = array<i32>} : memref<1x128xi32, #tpu.memory_space<vmem>>, vector<1x128xi32>,
      %54 = vector.shape_cast %52 : vector<1x128xi32> to vector<1x1x128xi32>
      %c0_27 = arith.constant 0 : index
      %c0_28 = arith.constant 0 : index
      %c0_29 = arith.constant 0 : index
      %55 = vector.load %arg7[%c0_27, %c0_28, %c0_29] : memref<1x1x128xi32, #tpu.memory_space<vmem>>, vector<1x1x128xi32>
      tpu.vector_store %arg7[%c0_27, %c0_28, %c0_29], %54 {strides = array<i32>} : memref<1x1x128xi32, #tpu.memory_space<vmem>>, vector<1x1x128xi32>,
      %cst_30 = arith.constant 0.000000e+00 : f32
      %56 = vector.broadcast %cst_30 : f32 to vector<8x128xf32>
      %c0_31 = arith.constant 0 : index
      %c0_32 = arith.constant 0 : index
      %57 = vector.load %arg11[%c0_31, %c0_32] : memref<8x128xf32, #tpu.memory_space<vmem>>, vector<8x128xf32>
      tpu.vector_store %arg11[%c0_31, %c0_32], %56 {strides = array<i32>} : memref<8x128xf32, #tpu.memory_space<vmem>>, vector<8x128xf32>,
    } else {
    }
    %c128_i32 = arith.constant 128 : i32
    %8 = arith.muli %arg1, %c128_i32 : i32
    %9 = tpu.assume_multiple %8, 128 : i32
    %c0 = arith.constant 0 : index
    %c0_4 = arith.constant 0 : index
    %10 = vector.load %arg10[%c0, %c0_4] : memref<1x128xi32, #tpu.memory_space<vmem>>, vector<1x128xi32>
    %11 = vector.broadcast %9 : i32 to vector<1x128xi32>
    %12 = arith.subi %10, %11 : vector<1x128xi32>
    %c0_i32_5 = arith.constant 0 : i32
    %13 = vector.broadcast %c0_i32_5 : i32 to vector<1x128xi32>
    %14 = arith.cmpi sge, %12, %13 : vector<1x128xi32>
    %c128_i32_6 = arith.constant 128 : i32
    %15 = vector.broadcast %c128_i32_6 : i32 to vector<1x128xi32>
    %16 = arith.cmpi slt, %12, %15 : vector<1x128xi32>
    %17 = arith.andi %14, %16 : vector<1x128xi1>
    %cst = arith.constant 1.000000e+00 : f32
    %cst_7 = arith.constant 0.000000e+00 : f32
    %18 = vector.broadcast %cst : f32 to vector<1x128xf32>
    %19 = vector.broadcast %cst_7 : f32 to vector<1x128xf32>
    %20 = arith.select %17, %18, %19 : vector<1x128xi1>, vector<1x128xf32>
    %21 = vector.shape_cast %20 : vector<1x128xf32> to vector<1x1x128xf32>
    %cst_8 = arith.constant dense<0xFF800000> : vector<1xf32>
    %22 = vector.multi_reduction <maximumf>, %21, %cst_8 [1, 2] : vector<1x1x128xf32> to vector<1xf32>
    %23 = vector.shape_cast %22 : vector<1xf32> to vector<1x1x1xf32>
    %24 = vector.extract %23[0, 0, 0] : f32 from vector<1x1x1xf32>
    %cst_9 = arith.constant 0.000000e+00 : f32
    %25 = arith.cmpf ogt, %24, %cst_9 : f32
    %26 = arith.extui %25 : i1 to i32
    %c0_i32_10 = arith.constant 0 : i32
    %27 = arith.cmpi ne, %26, %c0_i32_10 : i32
    scf.if %27 {
      %31 = tpu.iota {dimensions = array<i32: 0>} : vector<128x128xi32>
      %32 = vector.broadcast %12 : vector<1x128xi32> to vector<128x128xi32>
      %33 = arith.cmpi eq, %32, %31 : vector<128x128xi32>
      %34 = arith.extui %33 : vector<128x128xi1> to vector<128x128xi32>
      %35 = arith.sitofp %34 : vector<128x128xi32> to vector<128x128xf32>
      %36 = arith.truncf %35 : vector<128x128xf32> to vector<128x128xbf16>
      %c0_13 = arith.constant 0 : index
      %c0_14 = arith.constant 0 : index
      %37 = vector.load %arg11[%c0_13, %c0_14] : memref<8x128xf32, #tpu.memory_space<vmem>>, vector<8x128xf32>
      %c0_15 = arith.constant 0 : index
      %c0_16 = arith.constant 0 : index
      %38 = vector.load %arg6[%c0_15, %c0_16] : memref<8x128xf32, #tpu.memory_space<vmem>>, vector<8x128xf32>
      %39 = arith.truncf %38 : vector<8x128xf32> to vector<8x128xbf16>
      %cst_17 = arith.constant dense<0.000000e+00> : vector<8x128xf32>
      %40 = tpu.matmul %39, %36, %cst_17 {dimension_numbers = #tpu.dot_dimension_numbers<[1], [0], [0], [1], [0, 0, 1, 1], [], []>} : vector<8x128xbf16>, vector<128x128xbf16>, vector<8x128xf32> -> vector<8x128xf32>
      %41 = arith.addf %37, %40 : vector<8x128xf32>
      %c0_18 = arith.constant 0 : index
      %c0_19 = arith.constant 0 : index
      %42 = vector.load %arg11[%c0_18, %c0_19] : memref<8x128xf32, #tpu.memory_space<vmem>>, vector<8x128xf32>
      tpu.vector_store %arg11[%c0_18, %c0_19], %41 {strides = array<i32>} : memref<8x128xf32, #tpu.memory_space<vmem>>, vector<8x128xf32>,
    } else {
    }
    %c0_i32_11 = arith.constant 0 : i32
    %28 = arith.cmpi eq, %arg1, %c0_i32_11 : i32
    %29 = arith.extui %28 : i1 to i32
    %c0_i32_12 = arith.constant 0 : i32
    %30 = arith.cmpi ne, %29, %c0_i32_12 : i32
    scf.if %30 {
      %c0_13 = arith.constant 0 : index
      %c0_14 = arith.constant 0 : index
      %31 = vector.load %arg10[%c0_13, %c0_14] : memref<1x128xi32, #tpu.memory_space<vmem>>, vector<1x128xi32>
      %c0_i32_15 = arith.constant 0 : i32
      %32 = vector.broadcast %c0_i32_15 : i32 to vector<1x128xi32>
      %33 = arith.cmpi sge, %31, %32 : vector<1x128xi32>
      %c0_16 = arith.constant 0 : index
      %c0_17 = arith.constant 0 : index
      %34 = vector.load %arg11[%c0_16, %c0_17] : memref<8x128xf32, #tpu.memory_space<vmem>>, vector<8x128xf32>
      %35 = vector.extract_strided_slice %34 {offsets = [0, 0], sizes = [1, 128], strides = [1, 1]} : vector<8x128xf32> to vector<1x128xf32>
      %cst_18 = arith.constant 2.560000e+02 : f32
      %36 = vector.broadcast %cst_18 : f32 to vector<1x128xf32>
      %37 = arith.mulf %35, %36 : vector<1x128xf32>
      %38 = vector.extract_strided_slice %34 {offsets = [1, 0], sizes = [1, 128], strides = [1, 1]} : vector<8x128xf32> to vector<1x128xf32>
      %39 = arith.addf %37, %38 : vector<1x128xf32>
      %cst_19 = arith.constant 5.000000e-01 : f32
      %40 = vector.broadcast %cst_19 : f32 to vector<1x128xf32>
      %41 = arith.addf %39, %40 : vector<1x128xf32>
      %42 = arith.fptosi %41 : vector<1x128xf32> to vector<1x128xi32>
      %43 = vector.extract_strided_slice %34 {offsets = [2, 0], sizes = [1, 128], strides = [1, 1]} : vector<8x128xf32> to vector<1x128xf32>
      %cst_20 = arith.constant 2.560000e+02 : f32
      %44 = vector.broadcast %cst_20 : f32 to vector<1x128xf32>
      %45 = arith.mulf %43, %44 : vector<1x128xf32>
      %46 = vector.extract_strided_slice %34 {offsets = [3, 0], sizes = [1, 128], strides = [1, 1]} : vector<8x128xf32> to vector<1x128xf32>
      %47 = arith.addf %45, %46 : vector<1x128xf32>
      %cst_21 = arith.constant 5.000000e-01 : f32
      %48 = vector.broadcast %cst_21 : f32 to vector<1x128xf32>
      %49 = arith.addf %47, %48 : vector<1x128xf32>
      %50 = arith.fptosi %49 : vector<1x128xf32> to vector<1x128xi32>
      %c0_22 = arith.constant 0 : index
      %c0_23 = arith.constant 0 : index
      %51 = vector.load %arg8[%c0_22, %c0_23] : memref<1x128xi32, #tpu.memory_space<vmem>>, vector<1x128xi32>
      %52 = arith.select %33, %42, %51 : vector<1x128xi1>, vector<1x128xi32>
      %c0_24 = arith.constant 0 : index
      %c0_25 = arith.constant 0 : index
      %53 = vector.load %arg8[%c0_24, %c0_25] : memref<1x128xi32, #tpu.memory_space<vmem>>, vector<1x128xi32>
      tpu.vector_store %arg8[%c0_24, %c0_25], %52 {strides = array<i32>} : memref<1x128xi32, #tpu.memory_space<vmem>>, vector<1x128xi32>,
      %c0_26 = arith.constant 0 : index
      %c0_27 = arith.constant 0 : index
      %54 = vector.load %arg9[%c0_26, %c0_27] : memref<1x128xi32, #tpu.memory_space<vmem>>, vector<1x128xi32>
      %55 = arith.select %33, %50, %54 : vector<1x128xi1>, vector<1x128xi32>
      %c0_28 = arith.constant 0 : index
      %c0_29 = arith.constant 0 : index
      %56 = vector.load %arg9[%c0_28, %c0_29] : memref<1x128xi32, #tpu.memory_space<vmem>>, vector<1x128xi32>
      tpu.vector_store %arg9[%c0_28, %c0_29], %55 {strides = array<i32>} : memref<1x128xi32, #tpu.memory_space<vmem>>, vector<1x128xi32>,
    } else {
    }
    return
  }
  func.func @transform_0(%arg0: i32, %arg1: i32) -> (i32, i32) {
    %c0_i32 = arith.constant 0 : i32
    %c0_i32_0 = arith.constant 0 : i32
    %c0_i32_1 = arith.constant 0 : i32
    return %c0_i32, %c0_i32_0 : i32, i32
  }
  func.func @transform_1(%arg0: i32, %arg1: i32) -> (i32, i32) {
    %c0_i32 = arith.constant 0 : i32
    %c0_i32_0 = arith.constant 0 : i32
    %c0_i32_1 = arith.constant 0 : i32
    return %c0_i32, %c0_i32_0 : i32, i32
  }
  func.func @transform_2(%arg0: i32, %arg1: i32) -> (i32, i32) {
    %c0_i32 = arith.constant 0 : i32
    %c0_i32_0 = arith.constant 0 : i32
    %c0_i32_1 = arith.constant 0 : i32
    return %c0_i32, %c0_i32_0 : i32, i32
  }
  func.func @transform_3(%arg0: i32, %arg1: i32) -> (i32, i32, i32) {
    %c0_i32 = arith.constant 0 : i32
    %c0_i32_0 = arith.constant 0 : i32
    %c0_i32_1 = arith.constant 0 : i32
    return %arg0, %c0_i32, %c0_i32_0 : i32, i32, i32
  }
  func.func @transform_4(%arg0: i32, %arg1: i32) -> (i32, i32) {
    %c0_i32 = arith.constant 0 : i32
    %c0_i32_0 = arith.constant 0 : i32
    return %c0_i32, %arg1 : i32, i32
  }
  func.func @transform_5(%arg0: i32, %arg1: i32) -> (i32, i32, i32) {
    %c0_i32 = arith.constant 0 : i32
    %c0_i32_0 = arith.constant 0 : i32
    %c0_i32_1 = arith.constant 0 : i32
    return %arg0, %c0_i32, %c0_i32_0 : i32, i32, i32
  }
}

</mosaic_0001>

<bundles_post_ra>
// kernel: tpu_custom_call.1
= control target key start
LH: loop header
LB: loop body
LE: loop exit
PB: predicated region body
PF: predicated region fallthrough
CT: control target
= control target key end

     0   :  { %10 = vsyncpa [#allocation7], 0  ;;  %s1041_s0 = inlined_call_operand.hbm [shape: s32[1,128], index: 0, kind: input, shape index: {}]   ;;  %s1042_s1 = inlined_call_operand.vmem [shape: s32[1,128], index: 1, kind: input, shape index: {}]   ;;  %s1043_s2 = inlined_call_operand.vmem [shape: f32[1,128], index: 2, kind: input, shape index: {}]   ;;  %s1044_s3 = inlined_call_operand.vmem [shape: f32[3,1,128], index: 3, kind: input, shape index: {}]   ;;  %s1045_s4 = inlined_call_operand.vmem [shape: f32[8,128], index: 4, kind: input, shape index: {}]   ;;  %s1046_s5 = inlined_call_operand.hbm [shape: s32[3,1,128], index: 5, kind: output, shape index: {}]  }
   0x1   :  { %11 = vsyncpa [#allocation8], 0 }
   0x2   :  { %13 = vsyncpa [#allocation8 + $0x1], 0  ;;  %s873_s18 = smov 0   ;;  %s875_s19 = smov 0  }
   0x3   :  { %s877_s20 = smov 0   ;;  %s879_s21 = smov 0  }
   0x4   :  { %s881_s22 = smov 0   ;;  %s883_s23 = smov 0  }
   0x5 LB: > { %s572_s24 = sadd.s32 4294967295, %s834_s23   ;;  %s573_s25 = sadd.s32 4294967294, %s834_s23   ;;  %s834_s23 = sphi %s883_s23, %s19_s23   ;;  %s830_s22 = sphi %s881_s22, %s1064_s22   ;;  %s826_s21 = sphi %s879_s21, %s1063_s21   ;;  %s822_s20 = sphi %s877_s20, %s1062_s20   ;;  %s818_s19 = sphi %s875_s19, %s1061_s19   ;;  %s814_s18 = sphi %s873_s18, %s1060_s18  }
   0x6   : > { %s31_s26 = sadd.s32 1, %s830_s22  ;;  %s153_s27 = sadd.s32 1, %s822_s20 }
   0x7   : > { %p33_p0 = scmp.ge.s32.totalorder %s31_s26, 3  ;;  %p163_p1 = scmp.ne.s32.totalorder %s822_s20, %s818_s19 }
   0x8   : > { %p164_p2 = scmp.eq.s32.totalorder %s572_s24, 2  ;;  %p169_p3 = scmp.ne.s32.totalorder %s818_s19, %s814_s18 }
   0x9   : > { %s1066_s26 = smov (%p33_p0, %s31_s26), 0  ;;  %p170_p5 = scmp.eq.s32.totalorder %s573_s25, 2 }
   0xa   : > { %p913_p4 = por %p164_p2, %p163_p1  ;;  %s150_s29 = ssub.s32 %s830_s22, %s1066_s26 }
   0xb   : > { %p574_p6 = scmp.ge.s32.totalorder %s834_s23, 1  ;;  %p151_p7 = scmp.eq.s32.totalorder %s150_s29, 0 }
   0xc   : > { %s1051_s28 = scalar_select %p913_p4, 1, 0 }
   0xd   : > { %p920_p8 = por %p170_p5, %p169_p3  ;;  %p177_p9 = scmp.lt.s32.totalorder %s834_s23, 4 }
   0xe   : > { %s926_s6 = scalar_select %p151_p7, %s822_s20, %s153_s27  }
   0xf   : > { %s1052_s30 = scalar_select %p920_p8, 1, 0 }
  0x10   : > { %p928_p10 = pnand %p574_p6, %p177_p9  ;;  %p932_p11 = scmp.eq.s32.totalorder %s572_s24, 0 }
  0x11   : > { %s836_s9 = smov [#allocation6]   ;;  %s724_s14 = scalar_lea.hbm %s1041_s0, 16 }
  0x12   : > { %s1053_s7 = scalar_select %p928_p10, 1, 0 }
  0x13   : > { %s1054_s8 = scalar_select %p932_p11, 1, 0 }
  0x14   : > { %p659_p12 = pneg %p928_p10  ;;  %s190_s10 = sshll.u32 %s836_s9, 4  ;;  %s191_s10 = int_to_ptr.vmem [resolvable:$true] %s190_s10 }
  0x15   : > { %p725_p0 = scmp.ne.s32.totalorder %s1041_s0, %s724_s14  ;;  %p731_p5 = scmp.lt.u32.totalorder %s724_s14, %s1041_s0 }
  0x16   : > { %p940_p13 = pnand %p932_p11, %p659_p12 }
  0x18   : > { %p726_p1 = pneg %p940_p13 }
  0x1a   : > { %p727_p2 = pnand %p726_p1, %p725_p0 }
  0x1c   : > { %p728_p3 = pneg %p727_p2 }
  0x1e   : > { %p733_p6 = pnand %p731_p5, %p728_p3 }
  0x20   : > { %736 = shalt.err (!%p733_p6)
}
  0x21   : > { %s737_s25 = scalar_lea.vmem %s191_s10, 16  ;;  %s744_s27 = scalar_lea.vmem %s191_s10, 32 }
  0x22   : > { %p738_p7 = scmp.ne.s32.totalorder %s191_s10, %s737_s25  ;;  %p745_p8 = scmp.lt.s32.totalorder %s191_s10, %s191_s10 }
  0x23   : > { %p746_p4 = scmp.lt.s32.totalorder %s744_s27, %s737_s25 }
  0x24   : > { %p740_p9 = pnand %p738_p7, %p726_p1 }
  0x25   : > { %p747_p11 = por %p746_p4, %p745_p8 }
  0x26   : > { %p741_p12 = pneg %p740_p9 }
  0x28   : > { %p748_p10 = pnand %p747_p11, %p741_p12 }
  0x2a   : > { %751 = shalt.err (!%p748_p10)
}
  0x2b   : > { %662 = dma.hbm_to_vmem [thread:$0]  (!%p940_p13), %s1041_s0, 16, %s191_s10, [#allocation7]  }
  0x2c   : > { %p1056_p0 = scmp.ne.s32.totalorder %s1053_s7, 0 }
  0x2d   : > { %p1057_p2 = scmp.ne.s32.totalorder (!%p1056_p0), %s1054_s8, 0 }
  0x2e   : > { %222 = sbr.rel (%p1056_p0) target bundleno = 592 (0x250), region = 40 }
  0x35   : > { %805 = dma.done.wait (%p1057_p2), [#allocation7], 16  }
  0x36   : > { %807 = vsyncadd (%p1057_p2), [#allocation7], 4294967280  ;;  %s249_s12 = sand.u32 1, %s818_s19   ;;  %p251_p4 = scmp.lt.s32.totalorder %s826_s21, 2 }
  0x37   : > { %p259_p8 = scmp.eq.s32.totalorder %s826_s21, 0  ;;  %s975_s14 = scalar_lea.vmem [#allocation9], %s249_s12 }
  0x38   : > { %s252_s11 = scalar_select %p251_p4, %s826_s21, 2 }
  0x39   : > { %264 = sbr.rel (!%p259_p8) target bundleno = 64 (0x40), region = 48  ;;  %v265_v0 = vld [vmem:[#allocation6] sm:$0x1] (%p259_p8)  ;;  %v267_v1 = vld [vmem:[%s1042_s1] sm:$0x1] (%p259_p8) }
  0x3a   : > { %s253_s7 = scalar_lea.vmem %s1044_s3, %s252_s11  ;;  %266 = vst [vmem:[#allocation2] sm:$0x1] (%p259_p8), %v265_v0  ;;  %268 = vst [vmem:[#allocation3] sm:$0x1] (%p259_p8), %v267_v1 }
  0x40 PF: > { %v274_v3 = vld [vmem:[%s253_s7] sm:$0x1]  ;;  %v837_v6 = vmov 0.0   ;;  %vm301_vm7 = vcmask 1040384  }
  0x41   : > { %v273_v2 = vld [vmem:[#allocation3] sm:$0x1]  ;;  %292 = vst [vmem:[#allocation5] sm:$0xff] %v837_v6  ;;  %v284_v9 = vld [vmem:[%s1043_s2] sm:$0x1] }
  0x42   : > { %v275_v4 = vcvt.s32.f32 %v273_v2  ;;  %v581_v5 = vadd.s32 4294967295, %v273_v2  ;;  %vm285_vm1 = vcmp.le.f32.partialorder %v284_v9, 0.5  ;;  %vm286_vm2 = vcmp.gt.s32.totalorder %v273_v2, 0  ;;  %v272_v13 = vld [vmem:[#allocation2] sm:$0x1] }
  0x43   : > { %vm287_vm4 = vmand %vm285_vm1, %vm286_vm2 }
  0x44   : > { %v276_v7 = vmul.f32 %v275_v4, %v274_v3  ;;  %vm280_vm0 = vcmp.gt.s32.totalorder %v581_v5, 0 }
  0x45   : > { %v281_v11 = vsel %vm280_vm0, %v581_v5, 0 }
  0x46   : > { %v277_v8 = vfloor.f32 %v276_v7 }
  0x48   : > { %v647_v10 = vtrunc.f32 %v277_v8 }
  0x4a   : > { %v648_v12 = vcvt.f32.s32 %v647_v10 }
  0x4c   : > { %vm282_vm3 = vcmp.lt.s32.totalorder %v648_v12, %v281_v11 }
  0x4d   : > { %v283_v14 = vsel %vm282_vm3, %v648_v12, %v281_v11 }
  0x4e   : > { %v288_v15 = vadd.s32 %v283_v14, %v272_v13 }
  0x50   : > { %v289_v16 = vsel %vm287_vm4, %v288_v15, 4294967295 }
  0x51   : > { %290 = vst [vmem:[#allocation4] sm:$0x1] %v289_v16  ;;  %291 = vst [vmem:[%s975_s14] sm:$0x1] %v289_v16 }
  0x58   : > { %v294_v17 = vld [vmem:[#allocation4] sm:$0x1] }
  0x59   : > { %vm297_vm5 = vcmp.ge.s32.totalorder %v294_v17, 0  ;;  %vm298_vm6 = vcmp.lt.s32.totalorder %v294_v17, 128 }
  0x5a   : > { %vm299_vm8 = vmand %vm297_vm5, %vm298_vm6 }
  0x5b   : > { %v300_v18 = vsel %vm299_vm8, 1.0, %v837_v6 }
  0x5c   : > { %v302_v19 = vsel %vm301_vm7, %v300_v18, -inf }
  0x5d   : > { %303 = vmax.xlane.f32.xlu0 %v302_v19 }
  0xea   : > { %v304_v20 = vpop.xlane.xlu0 %303 }
  0xeb   : > { %v305_v21 = vrot.slane %v304_v20, 4 }
  0xed   : > { %v306_v22 = vmax.f32 %v304_v20, %v305_v21 }
  0xef   : > { %v307_v23 = vrot.slane %v306_v22, 2 }
  0xf1   : > { %v308_v24 = vmax.f32 %v306_v22, %v307_v23 }
  0xf3   : > { %v309_v25 = vrot.slane %v308_v24, 1 }
  0xf5   : > { %v310_v26 = vmax.f32 %v308_v24, %v309_v25 }
  0xf7   : > { %649 = vpush %v310_v26 }
 0x128   : > { %s650_s24 = spop %649 }
 0x129   : > { %p312_p10 = scmp.gt.f32.partialorder %s650_s24, 0.0 }
 0x12a   : > { %v316_v27 = vlaneseq (%p312_p10)  ;;  %v838_v28 = vmov (%p312_p10), 0.0   ;;  %vm839_vm9 = vmmov (%p312_p10), 0   ;;  %v840_v37 = vmov (%p312_p10), 1.0|1.0   ;;  %v394_v48 = vld [vmem:[%s1045_s4] sm:$0xff] (%p312_p10)  ;;  %v393_v50 = vld [vmem:[#allocation5] sm:$0xff] (%p312_p10) }
 0x12b   : > { %315 = sbr.rel (!%p312_p10) target bundleno = 554 (0x22a), region = 56  ;;  %627 = vmatprep.subr.bf16.mxu0 (%p312_p10), %v838_v28  ;;  %643 = vmatprep.mubr.msk.bf16.mxu0 (%p312_p10), %vm839_vm9, %v838_v28  ;;  %v395_v49 = vpack.c.bf16 (%p312_p10), %v394_v48, %v394_v48 }
 0x12c   : > { %v317_v29 = vshrl.u32 (%p312_p10), %v316_v27, 7 }
 0x12e   : > { %v318_v30 = vadd.s32 (%p312_p10), 8, %v317_v29  ;;  %v335_v31 = vsub.s32 (%p312_p10), 0, %v317_v29  ;;  %v319_v32 = vadd.s32 (%p312_p10), 16, %v317_v29  ;;  %v320_v33 = vadd.s32 (%p312_p10), 24, %v317_v29 }
 0x12f   : > { %v321_v35 = vadd.s32 (%p312_p10), 32, %v317_v29  ;;  %v322_v36 = vadd.s32 (%p312_p10), 40, %v317_v29  ;;  %v323_v38 = vadd.s32 (%p312_p10), 48, %v317_v29  ;;  %v324_v39 = vadd.s32 (%p312_p10), 56, %v317_v29 }
 0x130   : > { %v336_v34 = vrot.slane (%p312_p10), %v294_v17, %v335_v31  ;;  %v325_v40 = vadd.s32 (%p312_p10), 64, %v317_v29  ;;  %v326_v41 = vadd.s32 (%p312_p10), 72, %v317_v29  ;;  %v327_v42 = vadd.s32 (%p312_p10), 80, %v317_v29 }
 0x131   : > { %v328_v43 = vadd.s32 (%p312_p10), 88, %v317_v29  ;;  %v329_v44 = vadd.s32 (%p312_p10), 96, %v317_v29  ;;  %v330_v45 = vadd.s32 (%p312_p10), 104, %v317_v29  ;;  %v331_v46 = vadd.s32 (%p312_p10), 112, %v317_v29 }
 0x132   : > { %vm337_vm10 = vcmp.eq.s32.totalorder %v336_v34, %v317_v29  ;;  %vm338_vm11 = vcmp.eq.s32.totalorder %v336_v34, %v318_v30  ;;  %vm339_vm12 = vcmp.eq.s32.totalorder %v336_v34, %v319_v32  ;;  %vm340_vm13 = vcmp.eq.s32.totalorder %v336_v34, %v320_v33 }
 0x133   : > { %vm598_vm14 = vmpackc.low %vm338_vm11, %vm337_vm10  ;;  %vm341_vm0 = vcmp.eq.s32.totalorder %v336_v34, %v321_v35  ;;  %vm342_vm1 = vcmp.eq.s32.totalorder %v336_v34, %v322_v36  ;;  %vm343_vm3 = vcmp.eq.s32.totalorder %v336_v34, %v323_v38  ;;  %vm344_vm4 = vcmp.eq.s32.totalorder %v336_v34, %v324_v39 }
 0x134   : > { %628 = vmatpush3.bf16.msk.msra.mxu0 %vm598_vm14, %v840_v37  ;;  %vm600_vm15 = vmpackc.low %vm340_vm13, %vm339_vm12  ;;  %vm345_vm6 = vcmp.eq.s32.totalorder %v336_v34, %v325_v40  ;;  %vm346_vm7 = vcmp.eq.s32.totalorder %v336_v34, %v326_v41  ;;  %vm347_vm9 = vcmp.eq.s32.totalorder %v336_v34, %v327_v42  ;;  %vm348_vm10 = vcmp.eq.s32.totalorder %v336_v34, %v328_v43 }
 0x135   : > { %629 = vmatprep.subr.bf16.mxu0 %v838_v28  ;;  %vm602_vm2 = vmpackc.low %vm342_vm1, %vm341_vm0  ;;  %vm349_vm12 = vcmp.eq.s32.totalorder %v336_v34, %v329_v44  ;;  %vm350_vm13 = vcmp.eq.s32.totalorder %v336_v34, %v330_v45  ;;  %v332_v47 = vadd.s32 120, %v317_v29 }
 0x136   : > { %vm604_vm5 = vmpackc.low %vm344_vm4, %vm343_vm3 }
 0x137   : > { %vm606_vm8 = vmpackc.low %vm346_vm7, %vm345_vm6  ;;  %vm352_vm0 = vcmp.eq.s32.totalorder %v336_v34, %v332_v47 }
 0x138   : > { %630 = vmatpush3.bf16.msk.msra.mxu0 %vm600_vm15, %v840_v37  ;;  %vm608_vm11 = vmpackc.low %vm348_vm10, %vm347_vm9  ;;  %vm351_vm15 = vcmp.eq.s32.totalorder %v336_v34, %v331_v46 }
 0x139   : > { %631 = vmatprep.subr.bf16.mxu0 %v838_v28  ;;  %vm610_vm14 = vmpackc.low %vm350_vm13, %vm349_vm12 }
 0x13a   : > { %vm612_vm1 = vmpackc.low %vm352_vm0, %vm351_vm15 }
 0x13c   : > { %632 = vmatpush3.bf16.msk.msra.mxu0 %vm602_vm2, %v840_v37 }
 0x13d   : > { %633 = vmatprep.subr.bf16.mxu0 %v838_v28 }
 0x140   : > { %634 = vmatpush3.bf16.msk.msra.mxu0 %vm604_vm5, %v840_v37 }
 0x141   : > { %635 = vmatprep.subr.bf16.mxu0 %v838_v28 }
 0x144   : > { %636 = vmatpush3.bf16.msk.msra.mxu0 %vm606_vm8, %v840_v37 }
 0x145   : > { %637 = vmatprep.subr.bf16.mxu0 %v838_v28 }
 0x148   : > { %638 = vmatpush3.bf16.msk.msra.mxu0 %vm608_vm11, %v840_v37 }
 0x149   : > { %639 = vmatprep.subr.bf16.mxu0 %v838_v28 }
 0x14c   : > { %640 = vmatpush3.bf16.msk.msra.mxu0 %vm610_vm14, %v840_v37 }
 0x14d   : > { %641 = vmatprep.subr.bf16.mxu0 %v838_v28 }
 0x150   : > { %642 = vmatpush3.bf16.msk.msra.mxu0 %vm612_vm1, %v840_v37 }
 0x153   : > { %644 = vmatmul.mubr.bf16.vlgmr.msra.gmra.mrb[0].mxu0 %v395_v49 }
 0x226   : > { %v430_v51 = vpop.f32.mrb[0].mxu0 }
 0x227   : > { %v436_v52 = vadd.f32 %v430_v51, %v393_v50  ;;  %v645_v53 = vpop.f32.mrb[1].mxu0 }
 0x228   : > { %v433_v54 = vpop.f32.mrb[2].mxu0 }
 0x229   : > { %437 = vst [vmem:[#allocation5] sm:$0xff] %v436_v52  ;;  %v646_v55 = vpop.f32.mrb[3].mxu0 }
 0x22a PF: > { %v458_v57 = vlaneseq  ;;  %s614_s29 = sshll.u32 %s826_s21, 4  ;;  %v841_v60 = vmov 1966171168   ;;  %s485_s10 = sshll.u32 %s975_s14, 4  ;;  %s994_s10 = int_to_ptr.vmem [resolvable:$true] %s485_s10 }
 0x22b   : > { %v456_v61 = vunpack.c.l.s4 %v841_v60  ;;  %s991_s13 = scalar_lea.hbm %s1046_s5, %s614_s29  ;;  %s473_s7 = scalar_lea.sflag [#allocation8], %s249_s12 }
 0x22c   : > { %v459_v63 = vshrl.u32 %v458_v57, 7  ;;  %s752_s8 = scalar_lea.vmem %s994_s10, 16  ;;  %p1058_p13 = scmp.ne.s32.totalorder %s1051_s28, 0 }
 0x22d   : > { %v457_v0 = vunpack.c.0.s8 %v456_v61  ;;  %p753_p11 = scmp.ne.s32.totalorder %s994_s10, %s752_s8  ;;  %s842_s21 = smov [#allocation9]  }
 0x22e   : > { %s756_s15 = sshll.u32 %s842_s21, 4  ;;  %s757_s15 = int_to_ptr.vmem [resolvable:$false] %s756_s15 }
 0x22f   : > { %p754_p1 = pnand %p753_p11, %p1058_p13  ;;  %s758_s16 = scalar_lea.vmem %s757_s15, 32 }
 0x230   : > { %v443_v56 = vld [vmem:[#allocation5] sm:$0xff]  ;;  %p759_p5 = scmp.lt.s32.totalorder %s994_s10, %s757_s15  ;;  %p760_p6 = scmp.lt.s32.totalorder %s758_s16, %s752_s8 }
 0x231   : > { %v444_v58 = vmul.f32 256.0, %v443_v56  ;;  %v446_v59 = vrot.slane %v443_v56, 1  ;;  %p755_p3 = pneg %p754_p1 }
 0x232   : > { %p761_p7 = por %p760_p6, %p759_p5 }
 0x233   : > { %v448_v62 = vadd.f32 %v446_v59, %v444_v58 }
 0x234   : > { %p762_p9 = pnand %p761_p7, %p755_p3 }
 0x236   : > { %765 = shalt.err (!%p762_p9)
}
 0x237   : > { %s766_s12 = scalar_lea.hbm %s991_s13, 16  ;;  %s770_s24 = scalar_lea.hbm %s1046_s5, 48 }
 0x238   : > { %p767_p12 = scmp.ne.s32.totalorder %s991_s13, %s766_s12  ;;  %p771_p4 = scmp.lt.u32.totalorder %s991_s13, %s1046_s5 }
 0x239   : > { %p772_p8 = scmp.lt.u32.totalorder %s770_s24, %s766_s12  ;;  %p774_p11 = scmp.lt.u32.totalorder %s766_s12, %s991_s13 }
 0x23a   : > { %p768_p0 = pnand %p767_p12, %p1058_p13 }
 0x23b   : > { %p773_p10 = por %p772_p8, %p771_p4 }
 0x23c   : > { %p769_p2 = pneg %p768_p0 }
 0x23d   : > { %p775_p1 = por %p774_p11, %p773_p10 }
 0x23f   : > { %p776_p3 = pnand %p775_p1, %p769_p2 }
 0x241   : > { %779 = shalt.err (!%p776_p3)
}
 0x242   : > { %657 = dma.vmem_to_hbm [thread:$0]  (%p1058_p13), %s994_s10, 16, %s991_s13, %s473_s7   ;;  %v441_v1 = vld [vmem:[#allocation4] sm:$0x1]  ;;  %v449_v2 = vadd.f32 0.5, %v448_v62  ;;  %v460_v4 = vsub.s32 %v457_v0, %v459_v63  ;;  %v451_v5 = vld [vmem:[#allocation2] sm:$0x1] }
 0x243   : > { %vm442_vm2 = vcmp.ge.s32.totalorder %v441_v1, 0  ;;  %v454_v10 = vld [vmem:[#allocation3] sm:$0x1] }
 0x244   : > { %v651_v3 = vtrunc.f32 %v449_v2 }
 0x246   : > { %v652_v6 = vcvt.f32.s32 %v651_v3 }
 0x248   : > { %v452_v7 = vsel %vm442_vm2, %v652_v6, %v451_v5  ;;  %v461_v8 = vrot.slane %v652_v6, %v460_v4 }
 0x249   : > { %453 = vst [vmem:[#allocation2] sm:$0x1] %v452_v7 }
 0x24a   : > { %v468_v9 = vrot.slane %v461_v8, %v460_v4 }
 0x24c   : > { %v469_v11 = vcombine.high %v468_v9, %v468_v9 }
 0x24e   : > { %v470_v12 = vsel %vm442_vm2, %v469_v11, %v454_v10 }
 0x24f   : > { %471 = vst [vmem:[#allocation3] sm:$0x1] %v470_v12 }
 0x250 PF: > { %p669_p13 = scmp.ge.s32.totalorder %s834_s23, 2  ;;  %s497_s28 = sand.u32 1, %s814_s18  }
 0x251   : > { %p1059_p5 = scmp.ne.s32.totalorder %s1052_s30, 0  ;;  %s498_s29 = scalar_lea.sflag [#allocation8], %s497_s28 }
 0x253   : > { %p664_p6 = pnand %p669_p13, %p1059_p5 }
 0x255   : > { %809 = dma.done.wait (!%p664_p6), %s498_s29, 16  }
 0x256   : > { %811 = vsyncadd (!%p664_p6), %s498_s29, 4294967280  ;;  %s19_s23 = sadd.s32 1, %s834_s23   ;;  %s1060_s18 = smov %s818_s19 }
 0x257   : > { %p16_p7 = scmp.ge.s32.totalorder %s19_s23, 5   ;;  %s1061_s19 = smov %s822_s20 }
 0x258   : > { %s1062_s20 = smov %s926_s6  ;;  %s1063_s21 = smov %s830_s22 }
 0x259   : > { %s1064_s22 = smov %s1066_s26  ;;  %18 = sbr.rel (!%p16_p7) target bundleno = 5 (0x5), region = 99 }
 0x260   :  { %502 = vsyncpa [#allocation7], 1 }
 0x261   :  { %504 = vsyncpa [#allocation7 + $0x1], 1 }
 0x262   :  { %505 = vsyncpa [#allocation8], 1 }
 0x263   :  { %507 = vsyncpa [#allocation8 + $0x1], 1 }

</bundles_post_ra>
